<compile_context>
chip_gen: v7x
topology: tpu7x:2x2x1
jax: 0.10.0
libtpu: 0.0.40
codegen_flags: <defaults>
</compile_context>

<pallas_src>
import jax
import jax.numpy as jnp
from jax.experimental import pallas as pl
from jax.experimental.pallas import tpu as pltpu


def _decoder_step_kernel(tok_ref, h0_ref, c0_ref, enc_ref, tbl_ref,
                         wc_ref, bc_ref, wl_ref, bl_ref, wo_ref, bo_ref,
                         h1_ref, c1_ref, out_ref):
    """One fused decoder step for a (TB,)-batch tile.

    Outputs: h1 (TB,H), c1 (TB,H) [aliased onto h0/c0 HBM buffers], and a
    lane-dense packed slab (TB,P) = [attn | logp | zero-pad] written with a
    single unmasked 128-lane store (the wrapper slices it apart).
    """
    h0 = h0_ref[...].astype(jnp.float32)                 # (TB, H)
    c0 = c0_ref[...].astype(jnp.float32)                 # (TB, H)
    enc = enc_ref[...].astype(jnp.float32)               # (TB, S, H)
    TB, H = h0.shape
    S = enc.shape[1]
    O = tbl_ref.shape[0]

    # ---- embedding lookup fused in-kernel (one-hot matmul; table is tiny) ----
    # TODO(synk): for production vocab sizes use scalar-prefetched tokens +
    #             pl.Element row DMA instead of a resident VMEM table.
    tok = tok_ref[...]                                            # (TB, 1) int32
    vocab = jax.lax.broadcasted_iota(jnp.int32, (TB, O), 1)
    onehot = (vocab == tok).astype(jnp.float32)                   # (TB, O)
    emb = jnp.dot(onehot, tbl_ref[...].astype(jnp.float32),
                  preferred_element_type=jnp.float32)             # (TB, H)
    # TODO(synk): Dropout is eval-mode identity (no RNG in this inference step).

    # ---- dot-product attention: VPU multiply + XLU reduce (no batched einsum,
    #      which would lower to TB tiny per-batch MXU matmuls) ----
    scores = jnp.sum(h0[:, None, :] * enc, axis=-1)               # (TB, S)
    m = jnp.max(scores, axis=1, keepdims=True)
    e = jnp.exp(scores - m)
    # EUP approximate reciprocal: the divide rides a free bundle slot.
    attn = e * pl.reciprocal(jnp.sum(e, axis=1, keepdims=True), approx=True)
    context = jnp.sum(attn[:, :, None] * enc, axis=1)             # (TB, H)

    # ---- attn_combine(cat(embedded, context)) + relu, one fused matmul ----
    comb_in = jnp.concatenate([emb, context], axis=1)             # (TB, 2H)
    x = jnp.maximum(
        jnp.dot(comb_in, wc_ref[...], preferred_element_type=jnp.float32)
        + bc_ref[...], 0.0)                                       # (TB, H)

    # ---- single LSTM step: fused [x | h0] @ [w_ih.T ; w_hh.T]  (gates i,f,g,o) ----
    gates = (jnp.dot(jnp.concatenate([x, h0], axis=1), wl_ref[...],
                     preferred_element_type=jnp.float32)
             + bl_ref[...])                                       # (TB, 4H)
    # NOTE: with production H (>=128) each gate slice is a lane-aligned free
    # view; at H=32 these are cheap intra-vreg lane selects on the idle XLU.
    i_g = jax.nn.sigmoid(gates[:, 0 * H:1 * H])
    f_g = jax.nn.sigmoid(gates[:, 1 * H:2 * H])
    g_g = jnp.tanh(gates[:, 2 * H:3 * H])
    o_g = jax.nn.sigmoid(gates[:, 3 * H:4 * H])
    c1 = f_g * c0 + i_g * g_g
    h1 = o_g * jnp.tanh(c1)
    h1_ref[...] = h1.astype(h1_ref.dtype)
    c1_ref[...] = c1.astype(c1_ref.dtype)

    # ---- output projection + log_softmax(dim=1) ----
    # TODO(synk): at production vocab sizes, tile w_out over an O grid axis with
    #             an online max/LSE carry (mandatory for v7x's 64 MiB VMEM).
    logits = (jnp.dot(h1, wo_ref[...], preferred_element_type=jnp.float32)
              + bo_ref[...])                                      # (TB, O)
    lm = jnp.max(logits, axis=1, keepdims=True)
    lse = lm + jnp.log(jnp.sum(jnp.exp(logits - lm), axis=1, keepdims=True))
    logp = logits - lse

    # ---- lane-dense packed output: single unmasked 128-lane store ----
    pad = out_ref.shape[1] - (S + O)
    parts = [attn, logp]
    if pad > 0:
        parts.append(jnp.zeros((TB, pad), jnp.float32))
    out_ref[...] = jnp.concatenate(parts, axis=1).astype(out_ref.dtype)


def prepare_params(raw):
    """One-time weight preparation, hoisted out of the per-step call.

    Pre-transposes every weight, stacks the LSTM input/recurrent weights along
    the contraction dim and fuses the two LSTM biases, so the per-step wrapper
    launches exactly one op: the Pallas kernel.
    """
    return {
        'embedding': raw['embedding'],                                      # (O, H)
        'w_comb': raw['w_combine'].T,                                       # (2H, H) rows = [emb | context]
        'b_comb': raw['b_combine'][None, :],                                # (1, H)
        'w_lstm': jnp.concatenate([raw['w_ih'].T, raw['w_hh'].T], axis=0),  # (2H, 4H)
        'b_lstm': (raw['b_ih'] + raw['b_hh'])[None, :],                     # (1, 4H)
        'w_out': raw['w_out'].T,                                            # (H, O)
        'b_out': raw['b_out'][None, :],                                     # (1, O)
    }


def decoder_forward(params, tokens, h0, c0, enc):
    """One decoder step. `params` must come from `prepare_params`.
    Returns (log_probs, (h1, c1), attention_weights)."""
    B, H = h0.shape
    S = enc.shape[1]
    O = params['embedding'].shape[0]

    # Batch tile: 8 sublanes per tile; multiple tiles => grid axis sharded
    # across TensorCores on v7x (dimension_semantics="parallel").
    TB = 8 if B % 8 == 0 else B
    grid = (B // TB,)

    # Lane-dense packed output width for [attn | logp]: multiple of 128 lanes.
    P = ((S + O + 127) // 128) * 128

    tok2d = tokens.reshape(B, 1).astype(jnp.int32)

    in_specs = [
        pl.BlockSpec((TB, 1), lambda i: (i, 0)),          # tokens
        pl.BlockSpec((TB, H), lambda i: (i, 0)),          # h0
        pl.BlockSpec((TB, H), lambda i: (i, 0)),          # c0
        pl.BlockSpec((TB, S, H), lambda i: (i, 0, 0)),    # encoder outputs
        pl.BlockSpec((O, H), lambda i: (0, 0)),           # embedding table
        pl.BlockSpec((2 * H, H), lambda i: (0, 0)),       # combine weight (pre-T)
        pl.BlockSpec((1, H), lambda i: (0, 0)),           # combine bias
        pl.BlockSpec((2 * H, 4 * H), lambda i: (0, 0)),   # fused LSTM weight
        pl.BlockSpec((1, 4 * H), lambda i: (0, 0)),       # fused LSTM bias
        pl.BlockSpec((H, O), lambda i: (0, 0)),           # output weight (pre-T)
        pl.BlockSpec((1, O), lambda i: (0, 0)),           # output bias
    ]
    out_specs = (
        pl.BlockSpec((TB, H), lambda i: (i, 0)),          # h1 (aliases h0 HBM)
        pl.BlockSpec((TB, H), lambda i: (i, 0)),          # c1 (aliases c0 HBM)
        pl.BlockSpec((TB, P), lambda i: (i, 0)),          # packed [attn | logp]
    )
    out_shape = (
        jax.ShapeDtypeStruct((B, H), h0.dtype),
        jax.ShapeDtypeStruct((B, H), c0.dtype),
        jax.ShapeDtypeStruct((B, P), jnp.float32),
    )

    fn = pl.pallas_call(
        _decoder_step_kernel,
        grid=grid,
        in_specs=in_specs,
        out_specs=out_specs,
        out_shape=out_shape,
        # Update recurrent state in place (HBM aliasing) for autoregressive loops.
        input_output_aliases={1: 0, 2: 1},
        compiler_params=pltpu.CompilerParams(dimension_semantics=("parallel",)),
    )
    h1, c1, slab = fn(tok2d, h0, c0, enc,
                      params['embedding'], params['w_comb'], params['b_comb'],
                      params['w_lstm'], params['b_lstm'],
                      params['w_out'], params['b_out'])
    attn = slab[:, :S]
    logp = slab[:, S:S + O]
    return logp, (h1, c1), attn


def _reference_forward(raw, tokens, h0, c0, enc):
    """Pure-JAX reference (raw PyTorch-layout params) for correctness checking."""
    emb = jnp.take(raw['embedding'], tokens, axis=0)
    scores = jnp.einsum('bh,bsh->bs', h0, enc)
    attn = jax.nn.softmax(scores, axis=1)
    context = jnp.einsum('bs,bsh->bh', attn, enc)
    combined = jnp.concatenate([emb, context], axis=1)
    x = jax.nn.relu(combined @ raw['w_combine'].T + raw['b_combine'])
    gates = x @ raw['w_ih'].T + raw['b_ih'] + h0 @ raw['w_hh'].T + raw['b_hh']
    H = h0.shape[1]
    i_g = jax.nn.sigmoid(gates[:, :H])
    f_g = jax.nn.sigmoid(gates[:, H:2 * H])
    g_g = jnp.tanh(gates[:, 2 * H:3 * H])
    o_g = jax.nn.sigmoid(gates[:, 3 * H:])
    c1 = f_g * c0 + i_g * g_g
    h1 = o_g * jnp.tanh(c1)
    logits = h1 @ raw['w_out'].T + raw['b_out']
    logp = jax.nn.log_softmax(logits, axis=1)
    return logp, (h1, c1), attn


def init_params(key, hidden_units, output_size):
    H, O = hidden_units, output_size
    ks = jax.random.split(key, 9)
    s = 1.0 / jnp.sqrt(H)
    return {
        'embedding': jax.random.normal(ks[0], (O, H), jnp.float32),
        'w_combine': jax.random.uniform(ks[1], (H, 2 * H), jnp.float32, -s, s),
        'b_combine': jax.random.uniform(ks[2], (H,), jnp.float32, -s, s),
        'w_ih': jax.random.uniform(ks[3], (4 * H, H), jnp.float32, -s, s),
        'w_hh': jax.random.uniform(ks[4], (4 * H, H), jnp.float32, -s, s),
        'b_ih': jax.random.uniform(ks[5], (4 * H,), jnp.float32, -s, s),
        'b_hh': jax.random.uniform(ks[6], (4 * H,), jnp.float32, -s, s),
        'w_out': jax.random.uniform(ks[7], (O, H), jnp.float32, -s, s),
        'b_out': jax.random.uniform(ks[8], (O,), jnp.float32, -s, s),
    }


if __name__ == "__main__":
    B, H, O, S = 8, 32, 16, 8      # batch, hidden_units, output_size (vocab), enc seq len
    key = jax.random.PRNGKey(0)
    kp, kt, kh, kc, ke = jax.random.split(key, 5)

    raw = init_params(kp, H, O)
    params = prepare_params(raw)          # one-time prep, NOT per decode step
    tokens = jax.random.randint(kt, (B,), 0, O, jnp.int32)
    h0 = jax.random.normal(kh, (B, H), jnp.float32)
    c0 = jax.random.normal(kc, (B, H), jnp.float32)
    enc = jax.random.normal(ke, (B, S, H), jnp.float32)

    logp, (h1, c1), attn = decoder_forward(params, tokens, h0, c0, enc)
    jax.block_until_ready((logp, h1, c1, attn))

    # correctness check against pure-JAX reference; tolerance loosened slightly
    # because the softmax denominator uses the EUP approximate reciprocal.
    r_logp, (r_h1, r_c1), r_attn = _reference_forward(raw, tokens, h0, c0, enc)
    tol = dict(atol=5e-3, rtol=5e-3)
    assert jnp.allclose(attn, r_attn, **tol), "attention mismatch"
    assert jnp.allclose(h1, r_h1, **tol), "h1 mismatch"
    assert jnp.allclose(c1, r_c1, **tol), "c1 mismatch"
    assert jnp.allclose(logp, r_logp, **tol), "log-probs mismatch"

    print("KERNEL_OK")
</pallas_src>

<mosaic_0001>
module attributes {stable_mosaic.version = 11 : i64} {
  func.func @_decoder_step_kernel(%arg0: i32, %arg1: memref<8x1xi32, #tpu.memory_space<vmem>>, %arg2: memref<8x32xf32, #tpu.memory_space<vmem>>, %arg3: memref<8x32xf32, #tpu.memory_space<vmem>>, %arg4: memref<8x8x32xf32, #tpu.memory_space<vmem>>, %arg5: memref<16x32xf32, #tpu.memory_space<vmem>>, %arg6: memref<64x32xf32, #tpu.memory_space<vmem>>, %arg7: memref<1x32xf32, #tpu.memory_space<vmem>>, %arg8: memref<64x128xf32, #tpu.memory_space<vmem>>, %arg9: memref<1x128xf32, #tpu.memory_space<vmem>>, %arg10: memref<32x16xf32, #tpu.memory_space<vmem>>, %arg11: memref<1x16xf32, #tpu.memory_space<vmem>>, %arg12: memref<8x32xf32, #tpu.memory_space<vmem>>, %arg13: memref<8x32xf32, #tpu.memory_space<vmem>>, %arg14: memref<8x128xf32, #tpu.memory_space<vmem>>) attributes {dimension_semantics = [#tpu.dimension_semantics<parallel>], iteration_bounds = array<i64: 1>, scalar_prefetch = 0 : i64, scratch_operands = 0 : i64, tpu.core_type = #tpu.core_type<tc>, window_params = [{transform_indices = @transform_0, window_bounds = array<i64: 8, 1>}, {transform_indices = @transform_1, window_bounds = array<i64: 8, 32>}, {transform_indices = @transform_2, window_bounds = array<i64: 8, 32>}, {transform_indices = @transform_3, window_bounds = array<i64: 8, 8, 32>}, {pipeline_mode = #tpu.pipeline_mode<synchronous>, transform_indices = @transform_4, window_bounds = array<i64: 16, 32>}, {pipeline_mode = #tpu.pipeline_mode<synchronous>, transform_indices = @transform_5, window_bounds = array<i64: 64, 32>}, {pipeline_mode = #tpu.pipeline_mode<synchronous>, transform_indices = @transform_6, window_bounds = array<i64: 1, 32>}, {pipeline_mode = #tpu.pipeline_mode<synchronous>, transform_indices = @transform_7, window_bounds = array<i64: 64, 128>}, {pipeline_mode = #tpu.pipeline_mode<synchronous>, transform_indices = @transform_8, window_bounds = array<i64: 1, 128>}, {pipeline_mode = #tpu.pipeline_mode<synchronous>, transform_indices = @transform_9, window_bounds = array<i64: 32, 16>}, {pipeline_mode = #tpu.pipeline_mode<synchronous>, transform_indices = @transform_10, window_bounds = array<i64: 1, 16>}, {transform_indices = @transform_11, window_bounds = array<i64: 8, 32>}, {transform_indices = @transform_12, window_bounds = array<i64: 8, 32>}, {transform_indices = @transform_13, window_bounds = array<i64: 8, 128>}]} {
    %c0 = arith.constant 0 : index
    %c0_0 = arith.constant 0 : index
    %0 = vector.load %arg2[%c0, %c0_0] : memref<8x32xf32, #tpu.memory_space<vmem>>, vector<8x32xf32>
    %c0_1 = arith.constant 0 : index
    %c0_2 = arith.constant 0 : index
    %1 = vector.load %arg3[%c0_1, %c0_2] : memref<8x32xf32, #tpu.memory_space<vmem>>, vector<8x32xf32>
    %c0_3 = arith.constant 0 : index
    %c0_4 = arith.constant 0 : index
    %c0_5 = arith.constant 0 : index
    %2 = vector.load %arg4[%c0_3, %c0_4, %c0_5] : memref<8x8x32xf32, #tpu.memory_space<vmem>>, vector<8x8x32xf32>
    %c0_6 = arith.constant 0 : index
    %c0_7 = arith.constant 0 : index
    %3 = vector.load %arg1[%c0_6, %c0_7] : memref<8x1xi32, #tpu.memory_space<vmem>>, vector<8x1xi32>
    %4 = tpu.iota {dimensions = array<i32: 1>} : vector<8x16xi32>
    %5 = vector.broadcast %3 : vector<8x1xi32> to vector<8x16xi32>
    %6 = arith.cmpi eq, %4, %5 : vector<8x16xi32>
    %7 = arith.extui %6 : vector<8x16xi1> to vector<8x16xi32>
    %8 = arith.sitofp %7 : vector<8x16xi32> to vector<8x16xf32>
    %c0_8 = arith.constant 0 : index
    %c0_9 = arith.constant 0 : index
    %9 = vector.load %arg5[%c0_8, %c0_9] : memref<16x32xf32, #tpu.memory_space<vmem>>, vector<16x32xf32>
    %cst = arith.constant dense<0.000000e+00> : vector<8x32xf32>
    %10 = tpu.matmul %8, %9, %cst {dimension_numbers = #tpu.dot_dimension_numbers<[1], [0], [0], [1], [0, 0, 1, 1], [], []>} : vector<8x16xf32>, vector<16x32xf32>, vector<8x32xf32> -> vector<8x32xf32>
    %11 = vector.shape_cast %0 : vector<8x32xf32> to vector<8x1x32xf32>
    %12 = vector.broadcast %11 : vector<8x1x32xf32> to vector<8x8x32xf32>
    %13 = arith.mulf %12, %2 : vector<8x8x32xf32>
    %cst_10 = arith.constant dense<0.000000e+00> : vector<8x8xf32>
    %14 = vector.multi_reduction <add>, %13, %cst_10 [2] : vector<8x8x32xf32> to vector<8x8xf32>
    %cst_11 = arith.constant dense<0xFF800000> : vector<8xf32>
    %15 = vector.multi_reduction <maximumf>, %14, %cst_11 [1] : vector<8x8xf32> to vector<8xf32>
    %16 = vector.shape_cast %15 : vector<8xf32> to vector<8x1xf32>
    %17 = vector.broadcast %16 : vector<8x1xf32> to vector<8x8xf32>
    %18 = arith.subf %14, %17 : vector<8x8xf32>
    %19 = math.exp %18 : vector<8x8xf32>
    %cst_12 = arith.constant dense<0.000000e+00> : vector<8xf32>
    %20 = vector.multi_reduction <add>, %19, %cst_12 [1] : vector<8x8xf32> to vector<8xf32>
    %21 = vector.shape_cast %20 : vector<8xf32> to vector<8x1xf32>
    %22 = tpu.reciprocal %21 {approx = true} : vector<8x1xf32> -> vector<8x1xf32>
    %23 = vector.broadcast %22 : vector<8x1xf32> to vector<8x8xf32>
    %24 = arith.mulf %19, %23 : vector<8x8xf32>
    %25 = vector.shape_cast %24 : vector<8x8xf32> to vector<8x8x1xf32>
    %26 = vector.broadcast %25 : vector<8x8x1xf32> to vector<8x8x32xf32>
    %27 = arith.mulf %26, %2 : vector<8x8x32xf32>
    %cst_13 = arith.constant dense<0.000000e+00> : vector<8x32xf32>
    %28 = vector.multi_reduction <add>, %27, %cst_13 [1] : vector<8x8x32xf32> to vector<8x32xf32>
    %29 = tpu.concatenate %10, %28 in 1 : vector<8x32xf32>, vector<8x32xf32> -> vector<8x64xf32>
    %c0_14 = arith.constant 0 : index
    %c0_15 = arith.constant 0 : index
    %30 = vector.load %arg6[%c0_14, %c0_15] : memref<64x32xf32, #tpu.memory_space<vmem>>, vector<64x32xf32>
    %cst_16 = arith.constant dense<0.000000e+00> : vector<8x32xf32>
    %31 = tpu.matmul %29, %30, %cst_16 {dimension_numbers = #tpu.dot_dimension_numbers<[1], [0], [0], [1], [0, 0, 1, 1], [], []>} : vector<8x64xf32>, vector<64x32xf32>, vector<8x32xf32> -> vector<8x32xf32>
    %c0_17 = arith.constant 0 : index
    %c0_18 = arith.constant 0 : index
    %32 = vector.load %arg7[%c0_17, %c0_18] : memref<1x32xf32, #tpu.memory_space<vmem>>, vector<1x32xf32>
    %33 = vector.broadcast %32 : vector<1x32xf32> to vector<8x32xf32>
    %34 = arith.addf %31, %33 : vector<8x32xf32>
    %cst_19 = arith.constant 0.000000e+00 : f32
    %35 = vector.broadcast %cst_19 : f32 to vector<8x32xf32>
    %36 = arith.maximumf %34, %35 : vector<8x32xf32>
    %37 = tpu.concatenate %36, %0 in 1 : vector<8x32xf32>, vector<8x32xf32> -> vector<8x64xf32>
    %c0_20 = arith.constant 0 : index
    %c0_21 = arith.constant 0 : index
    %38 = vector.load %arg8[%c0_20, %c0_21] : memref<64x128xf32, #tpu.memory_space<vmem>>, vector<64x128xf32>
    %cst_22 = arith.constant dense<0.000000e+00> : vector<8x128xf32>
    %39 = tpu.matmul %37, %38, %cst_22 {dimension_numbers = #tpu.dot_dimension_numbers<[1], [0], [0], [1], [0, 0, 1, 1], [], []>} : vector<8x64xf32>, vector<64x128xf32>, vector<8x128xf32> -> vector<8x128xf32>
    %c0_23 = arith.constant 0 : index
    %c0_24 = arith.constant 0 : index
    %40 = vector.load %arg9[%c0_23, %c0_24] : memref<1x128xf32, #tpu.memory_space<vmem>>, vector<1x128xf32>
    %41 = vector.broadcast %40 : vector<1x128xf32> to vector<8x128xf32>
    %42 = arith.addf %39, %41 : vector<8x128xf32>
    %43 = vector.extract_strided_slice %42 {offsets = [0, 0], sizes = [8, 32], strides = [1, 1]} : vector<8x128xf32> to vector<8x32xf32>
    %44 = arith.negf %43 : vector<8x32xf32>
    %45 = math.exp %44 : vector<8x32xf32>
    %cst_25 = arith.constant 1.000000e+00 : f32
    %46 = vector.broadcast %cst_25 : f32 to vector<8x32xf32>
    %47 = arith.addf %46, %45 : vector<8x32xf32>
    %48 = arith.divf %46, %47 : vector<8x32xf32>
    %49 = vector.extract_strided_slice %42 {offsets = [0, 32], sizes = [8, 32], strides = [1, 1]} : vector<8x128xf32> to vector<8x32xf32>
    %50 = arith.negf %49 : vector<8x32xf32>
    %51 = math.exp %50 : vector<8x32xf32>
    %cst_26 = arith.constant 1.000000e+00 : f32
    %52 = vector.broadcast %cst_26 : f32 to vector<8x32xf32>
    %53 = arith.addf %52, %51 : vector<8x32xf32>
    %54 = arith.divf %52, %53 : vector<8x32xf32>
    %55 = vector.extract_strided_slice %42 {offsets = [0, 64], sizes = [8, 32], strides = [1, 1]} : vector<8x128xf32> to vector<8x32xf32>
    %56 = math.tanh %55 : vector<8x32xf32>
    %57 = vector.extract_strided_slice %42 {offsets = [0, 96], sizes = [8, 32], strides = [1, 1]} : vector<8x128xf32> to vector<8x32xf32>
    %58 = arith.negf %57 : vector<8x32xf32>
    %59 = math.exp %58 : vector<8x32xf32>
    %cst_27 = arith.constant 1.000000e+00 : f32
    %60 = vector.broadcast %cst_27 : f32 to vector<8x32xf32>
    %61 = arith.addf %60, %59 : vector<8x32xf32>
    %62 = arith.divf %60, %61 : vector<8x32xf32>
    %63 = arith.mulf %54, %1 : vector<8x32xf32>
    %64 = arith.mulf %48, %56 : vector<8x32xf32>
    %65 = arith.addf %63, %64 : vector<8x32xf32>
    %66 = math.tanh %65 : vector<8x32xf32>
    %67 = arith.mulf %62, %66 : vector<8x32xf32>
    %c0_28 = arith.constant 0 : index
    %c0_29 = arith.constant 0 : index
    %68 = vector.load %arg12[%c0_28, %c0_29] : memref<8x32xf32, #tpu.memory_space<vmem>>, vector<8x32xf32>
    tpu.vector_store %arg12[%c0_28, %c0_29], %67 {strides = array<i32>} : memref<8x32xf32, #tpu.memory_space<vmem>>, vector<8x32xf32>,
    %c0_30 = arith.constant 0 : index
    %c0_31 = arith.constant 0 : index
    %69 = vector.load %arg13[%c0_30, %c0_31] : memref<8x32xf32, #tpu.memory_space<vmem>>, vector<8x32xf32>
    tpu.vector_store %arg13[%c0_30, %c0_31], %65 {strides = array<i32>} : memref<8x32xf32, #tpu.memory_space<vmem>>, vector<8x32xf32>,
    %c0_32 = arith.constant 0 : index
    %c0_33 = arith.constant 0 : index
    %70 = vector.load %arg10[%c0_32, %c0_33] : memref<32x16xf32, #tpu.memory_space<vmem>>, vector<32x16xf32>
    %cst_34 = arith.constant dense<0.000000e+00> : vector<8x16xf32>
    %71 = tpu.matmul %67, %70, %cst_34 {dimension_numbers = #tpu.dot_dimension_numbers<[1], [0], [0], [1], [0, 0, 1, 1], [], []>} : vector<8x32xf32>, vector<32x16xf32>, vector<8x16xf32> -> vector<8x16xf32>
    %c0_35 = arith.constant 0 : index
    %c0_36 = arith.constant 0 : index
    %72 = vector.load %arg11[%c0_35, %c0_36] : memref<1x16xf32, #tpu.memory_space<vmem>>, vector<1x16xf32>
    %73 = vector.broadcast %72 : vector<1x16xf32> to vector<8x16xf32>
    %74 = arith.addf %71, %73 : vector<8x16xf32>
    %cst_37 = arith.constant dense<0xFF800000> : vector<8xf32>
    %75 = vector.multi_reduction <maximumf>, %74, %cst_37 [1] : vector<8x16xf32> to vector<8xf32>
    %76 = vector.shape_cast %75 : vector<8xf32> to vector<8x1xf32>
    %77 = vector.broadcast %76 : vector<8x1xf32> to vector<8x16xf32>
    %78 = arith.subf %74, %77 : vector<8x16xf32>
    %79 = math.exp %78 : vector<8x16xf32>
    %cst_38 = arith.constant dense<0.000000e+00> : vector<8xf32>
    %80 = vector.multi_reduction <add>, %79, %cst_38 [1] : vector<8x16xf32> to vector<8xf32>
    %81 = vector.shape_cast %80 : vector<8xf32> to vector<8x1xf32>
    %82 = math.log %81 : vector<8x1xf32>
    %83 = arith.addf %76, %82 : vector<8x1xf32>
    %84 = vector.broadcast %83 : vector<8x1xf32> to vector<8x16xf32>
    %85 = arith.subf %74, %84 : vector<8x16xf32>
    %cst_39 = arith.constant 0.000000e+00 : f32
    %86 = vector.broadcast %cst_39 : f32 to vector<8x104xf32>
    %87 = tpu.concatenate %24, %85, %86 in 1 : vector<8x8xf32>, vector<8x16xf32>, vector<8x104xf32> -> vector<8x128xf32>
    %c0_40 = arith.constant 0 : index
    %c0_41 = arith.constant 0 : index
    %88 = vector.load %arg14[%c0_40, %c0_41] : memref<8x128xf32, #tpu.memory_space<vmem>>, vector<8x128xf32>
    tpu.vector_store %arg14[%c0_40, %c0_41], %87 {strides = array<i32>} : memref<8x128xf32, #tpu.memory_space<vmem>>, vector<8x128xf32>,
    return
  }
  func.func @transform_0(%arg0: i32) -> (i32, i32) {
    %c0_i32 = arith.constant 0 : i32
    %c0_i32_0 = arith.constant 0 : i32
    return %arg0, %c0_i32 : i32, i32
  }
  func.func @transform_1(%arg0: i32) -> (i32, i32) {
    %c0_i32 = arith.constant 0 : i32
    %c0_i32_0 = arith.constant 0 : i32
    return %arg0, %c0_i32 : i32, i32
  }
  func.func @transform_2(%arg0: i32) -> (i32, i32) {
    %c0_i32 = arith.constant 0 : i32
    %c0_i32_0 = arith.constant 0 : i32
    return %arg0, %c0_i32 : i32, i32
  }
  func.func @transform_3(%arg0: i32) -> (i32, i32, i32) {
    %c0_i32 = arith.constant 0 : i32
    %c0_i32_0 = arith.constant 0 : i32
    %c0_i32_1 = arith.constant 0 : i32
    return %arg0, %c0_i32, %c0_i32_0 : i32, i32, i32
  }
  func.func @transform_4(%arg0: i32) -> (i32, i32) {
    %c0_i32 = arith.constant 0 : i32
    %c0_i32_0 = arith.constant 0 : i32
    %c0_i32_1 = arith.constant 0 : i32
    return %c0_i32, %c0_i32_0 : i32, i32
  }
  func.func @transform_5(%arg0: i32) -> (i32, i32) {
    %c0_i32 = arith.constant 0 : i32
    %c0_i32_0 = arith.constant 0 : i32
    %c0_i32_1 = arith.constant 0 : i32
    return %c0_i32, %c0_i32_0 : i32, i32
  }
  func.func @transform_6(%arg0: i32) -> (i32, i32) {
    %c0_i32 = arith.constant 0 : i32
    %c0_i32_0 = arith.constant 0 : i32
    %c0_i32_1 = arith.constant 0 : i32
    return %c0_i32, %c0_i32_0 : i32, i32
  }
  func.func @transform_7(%arg0: i32) -> (i32, i32) {
    %c0_i32 = arith.constant 0 : i32
    %c0_i32_0 = arith.constant 0 : i32
    %c0_i32_1 = arith.constant 0 : i32
    return %c0_i32, %c0_i32_0 : i32, i32
  }
  func.func @transform_8(%arg0: i32) -> (i32, i32) {
    %c0_i32 = arith.constant 0 : i32
    %c0_i32_0 = arith.constant 0 : i32
    %c0_i32_1 = arith.constant 0 : i32
    return %c0_i32, %c0_i32_0 : i32, i32
  }
  func.func @transform_9(%arg0: i32) -> (i32, i32) {
    %c0_i32 = arith.constant 0 : i32
    %c0_i32_0 = arith.constant 0 : i32
    %c0_i32_1 = arith.constant 0 : i32
    return %c0_i32, %c0_i32_0 : i32, i32
  }
  func.func @transform_10(%arg0: i32) -> (i32, i32) {
    %c0_i32 = arith.constant 0 : i32
    %c0_i32_0 = arith.constant 0 : i32
    %c0_i32_1 = arith.constant 0 : i32
    return %c0_i32, %c0_i32_0 : i32, i32
  }
  func.func @transform_11(%arg0: i32) -> (i32, i32) {
    %c0_i32 = arith.constant 0 : i32
    %c0_i32_0 = arith.constant 0 : i32
    return %arg0, %c0_i32 : i32, i32
  }
  func.func @transform_12(%arg0: i32) -> (i32, i32) {
    %c0_i32 = arith.constant 0 : i32
    %c0_i32_0 = arith.constant 0 : i32
    return %arg0, %c0_i32 : i32, i32
  }
  func.func @transform_13(%arg0: i32) -> (i32, i32) {
    %c0_i32 = arith.constant 0 : i32
    %c0_i32_0 = arith.constant 0 : i32
    return %arg0, %c0_i32 : i32, i32
  }
}

</mosaic_0001>

<bundles_post_ra>
// kernel: tpu_custom_call.1
= control target key start
LH: loop header
LB: loop body
LE: loop exit
PB: predicated region body
PF: predicated region fallthrough
CT: control target
= control target key end

     0   :  { %19 = vsyncpa [#allocation3], 0  ;;  %s1979_s0 = inlined_call_operand.vmem [shape: s32[8,1], index: 0, kind: input, shape index: {}]   ;;  %s1980_s1 = inlined_call_operand.hbm [shape: f32[8,32], index: 1, kind: input, shape index: {}, may-alias: {1,11}]   ;;  %s1981_s2 = inlined_call_operand.hbm [shape: f32[8,32], index: 2, kind: input, shape index: {}, may-alias: {2,12}]   ;;  %s1982_s3 = inlined_call_operand.vmem [shape: f32[8,8,32], index: 3, kind: input, shape index: {}]   ;;  %s1983_s4 = inlined_call_operand.vmem [shape: f32[16,32], index: 4, kind: input, shape index: {}]   ;;  %s1984_s5 = inlined_call_operand.vmem [shape: f32[64,32], index: 5, kind: input, shape index: {}]   ;;  %s1985_s6 = inlined_call_operand.hbm [shape: f32[1,32], index: 6, kind: input, shape index: {}]   ;;  %s1986_s7 = inlined_call_operand.vmem [shape: f32[64,128], index: 7, kind: input, shape index: {}]   ;;  %s1987_s8 = inlined_call_operand.hbm [shape: f32[1,128], index: 8, kind: input, shape index: {}]   ;;  %s1988_s9 = inlined_call_operand.vmem [shape: f32[32,16], index: 9, kind: input, shape index: {}]   ;;  %s1989_s10 = inlined_call_operand.hbm [shape: f32[1,16], index: 10, kind: input, shape index: {}]   ;;  %s1990_s11 = inlined_call_operand.hbm [shape: f32[8,32], index: 11, kind: output, shape index: {0}, may-alias: {1,11}]   ;;  %s1991_s12 = inlined_call_operand.hbm [shape: f32[8,32], index: 12, kind: output, shape index: {1}, may-alias: {2,12}]   ;;  %s1992_s13 = inlined_call_operand.hbm [shape: f32[8,128], index: 13, kind: output, shape index: {2}]  }
   0x1   :  { %20 = vsyncpa [#allocation6], 0 }
   0x2   :  { %21 = vsyncpa [#allocation9], 0 }
   0x3   :  { %22 = vsyncpa [#allocation4], 0 }
   0x4   :  { %23 = vsyncpa [#allocation13], 0  ;;  %s1459_s25 = smov [#allocation5]   ;;  %s1460_s27 = smov [#allocation8]  }
   0x5   :  { %s42_s26 = sshll.u32 %s1459_s25, 4  ;;  %s70_s28 = sshll.u32 %s1460_s27, 4  ;;  %s43_s26 = int_to_ptr.vmem [resolvable:$true] %s42_s26  ;;  %s71_s28 = int_to_ptr.vmem [resolvable:$true] %s70_s28 }
   0x6   :  { %s1273_s14 = scalar_lea.hbm %s1981_s2, 128 }
   0x7   :  { %p1274_p0 = scmp.ne.s32.totalorder %s1981_s2, %s1273_s14  ;;  %p1277_p1 = scmp.lt.u32.totalorder %s1273_s14, %s1981_s2 }
   0x9   :  { %p1279_p2 = pnand %p1277_p1, %p1274_p0 }
   0xb   :  { %1282 = shalt.err (!%p1279_p2)
}
   0xc   :  { %s1283_s19 = scalar_lea.vmem %s43_s26, 128  ;;  %p1288_p4 = scmp.lt.s32.totalorder %s43_s26, %s43_s26 }
   0xd   :  { %p1284_p3 = scmp.ne.s32.totalorder %s43_s26, %s1283_s19  ;;  %p1289_p5 = scmp.lt.s32.totalorder %s1283_s19, %s1283_s19 }
   0xf   :  { %p1290_p6 = por %p1289_p5, %p1288_p4 }
  0x11   :  { %p1291_p7 = pnand %p1290_p6, %p1284_p3 }
  0x13   :  { %1294 = shalt.err (!%p1291_p7)
}
  0x14   :  { %45 = dma.hbm_to_vmem [thread:$0]  %s1981_s2, 128, %s43_s26, [#allocation6]  }
  0x15   :  { %s1295_s24 = scalar_lea.hbm %s1987_s8, 16 }
  0x16   :  { %p1296_p8 = scmp.ne.s32.totalorder %s1987_s8, %s1295_s24  ;;  %p1299_p9 = scmp.lt.u32.totalorder %s1295_s24, %s1987_s8 }
  0x18   :  { %p1301_p10 = pnand %p1299_p9, %p1296_p8 }
  0x1a   :  { %1304 = shalt.err (!%p1301_p10)
}
  0x1b   :  { %s1305_s14 = scalar_lea.vmem %s71_s28, 16  ;;  %s1309_s15 = scalar_lea.vmem %s71_s28, 32 }
  0x1c   :  { %p1306_p11 = scmp.ne.s32.totalorder %s71_s28, %s1305_s14  ;;  %p1310_p12 = scmp.lt.s32.totalorder %s71_s28, %s71_s28 }
  0x1d   :  { %p1311_p13 = scmp.lt.s32.totalorder %s1309_s15, %s1305_s14 }
  0x1f   :  { %p1312_p0 = por %p1311_p13, %p1310_p12 }
  0x21   :  { %p1313_p1 = pnand %p1312_p0, %p1306_p11 }
  0x23   :  { %1316 = shalt.err (!%p1313_p1)
}
  0x24   :  { %73 = dma.hbm_to_vmem [thread:$0]  %s1987_s8, 16, %s71_s28, [#allocation9]  }
  0x25   :  { %s1461_s16 = smov [#allocation2]   ;;  %s1462_s18 = smov [#allocation7]  }
  0x26   :  { %s32_s17 = sshll.u32 %s1461_s16, 4  ;;  %s58_s19 = sshll.u32 %s1462_s18, 4  ;;  %s33_s17 = int_to_ptr.vmem [resolvable:$true] %s32_s17  ;;  %s59_s19 = int_to_ptr.vmem [resolvable:$true] %s58_s19 }
  0x27   :  { %s1317_s22 = scalar_lea.hbm %s1980_s1, 128 }
  0x28   :  { %p1318_p2 = scmp.ne.s32.totalorder %s1980_s1, %s1317_s22  ;;  %p1321_p3 = scmp.lt.u32.totalorder %s1317_s22, %s1980_s1 }
  0x2a   :  { %p1323_p4 = pnand %p1321_p3, %p1318_p2 }
  0x2c   :  { %1326 = shalt.err (!%p1323_p4)
}
  0x2d   :  { %s1327_s8 = scalar_lea.vmem %s33_s17, 128  ;;  %p1332_p6 = scmp.lt.s32.totalorder %s33_s17, %s33_s17 }
  0x2e   :  { %p1328_p5 = scmp.ne.s32.totalorder %s33_s17, %s1327_s8  ;;  %p1333_p7 = scmp.lt.s32.totalorder %s1327_s8, %s1327_s8 }
  0x30   :  { %p1334_p8 = por %p1333_p7, %p1332_p6 }
  0x32   :  { %p1335_p9 = pnand %p1334_p8, %p1328_p5 }
  0x34   :  { %1338 = shalt.err (!%p1335_p9)
}
  0x35   :  { %35 = dma.hbm_to_vmem [thread:$0]  %s1980_s1, 128, %s33_s17, [#allocation3]  }
  0x36   :  { %s1339_s15 = scalar_lea.hbm %s1985_s6, 16 }
  0x37   :  { %p1340_p10 = scmp.ne.s32.totalorder %s1985_s6, %s1339_s15  ;;  %p1343_p11 = scmp.lt.u32.totalorder %s1339_s15, %s1985_s6 }
  0x39   :  { %p1345_p12 = pnand %p1343_p11, %p1340_p10 }
  0x3b   :  { %1348 = shalt.err (!%p1345_p12)
}
  0x3c   :  { %s1349_s20 = scalar_lea.vmem %s59_s19, 16  ;;  %s1353_s21 = scalar_lea.vmem %s59_s19, 32 }
  0x3d   :  { %p1350_p13 = scmp.ne.s32.totalorder %s59_s19, %s1349_s20  ;;  %p1354_p0 = scmp.lt.s32.totalorder %s59_s19, %s59_s19 }
  0x3e   :  { %p1355_p1 = scmp.lt.s32.totalorder %s1353_s21, %s1349_s20 }
  0x40   :  { %p1356_p2 = por %p1355_p1, %p1354_p0 }
  0x42   :  { %p1357_p3 = pnand %p1356_p2, %p1350_p13 }
  0x44   :  { %1360 = shalt.err (!%p1357_p3)
}
  0x45   :  { %61 = dma.hbm_to_vmem [thread:$0]  %s1985_s6, 16, %s59_s19, [#allocation6]  }
  0x46   :  { %s1463_s22 = smov [#allocation10]   ;;  %s1361_s27 = scalar_lea.hbm %s1989_s10, 16 }
  0x47   :  { %s82_s23 = sshll.u32 %s1463_s22, 4  ;;  %p1362_p4 = scmp.ne.s32.totalorder %s1989_s10, %s1361_s27  ;;  %s83_s23 = int_to_ptr.vmem [resolvable:$true] %s82_s23 }
  0x48   :  { %p1365_p5 = scmp.lt.u32.totalorder %s1361_s27, %s1989_s10 }
  0x4a   :  { %p1367_p6 = pnand %p1365_p5, %p1362_p4 }
  0x4c   :  { %1370 = shalt.err (!%p1367_p6)
}
  0x4d   :  { %s1371_s14 = scalar_lea.vmem %s83_s23, 16  ;;  %s1375_s6 = scalar_lea.vmem %s83_s23, 32 }
  0x4e   :  { %p1372_p7 = scmp.ne.s32.totalorder %s83_s23, %s1371_s14  ;;  %p1376_p8 = scmp.lt.s32.totalorder %s83_s23, %s83_s23 }
  0x4f   :  { %p1377_p9 = scmp.lt.s32.totalorder %s1375_s6, %s1371_s14 }
  0x51   :  { %p1378_p10 = por %p1377_p9, %p1376_p8 }
  0x53   :  { %p1379_p11 = pnand %p1378_p10, %p1372_p7 }
  0x55   :  { %1382 = shalt.err (!%p1379_p11)
}
  0x56   :  { %85 = dma.hbm_to_vmem [thread:$0]  %s1989_s10, 16, %s83_s23, [#allocation9]  }
  0x57   :  { %1449 = dma.done.wait [#allocation3], 128  }
  0x58   :  { %1450 = vsyncadd [#allocation3], 4294967168 }
  0x59   :  { %1451 = dma.done.wait [#allocation6], 144  }
  0x5a   :  { %1452 = vsyncadd [#allocation6], 4294967152 }
  0x5b   :  { %1453 = dma.done.wait [#allocation9], 32  }
  0x5c   :  { %1454 = vsyncadd [#allocation9], 4294967264  ;;  %v112_v0 = vlaneseq  ;;  %v1464_v1 = vmov 1966171168   ;;  %v1609_v6 = vld [vmem:[#allocation2] sm:$0xff]  ;;  %vm294_vm0 = vcmask 261120  }
  0x5d   :  { %v199_v2 = vunpack.c.l.s4 %v1464_v1  ;;  %v197_v9 = vcombine.high %v1609_v6, %v1609_v6  ;;  %v1620_v13 = vld [vmem:[%s1982_s3] sm:$0xff]  ;;  %v1626_v18 = vld [vmem:[%s1982_s3 + $0x10] sm:$0xff]  ;;  %v1631_v19 = vld [vmem:[%s1982_s3 + $0x8] sm:$0xff]  ;;  %vm359_vm1 = vcmask 1041409   ;;  %vm361_vm2 = vcmask 1042434   ;;  %s1469_s16 = smov 32  }
  0x5e   :  { %v1606_v3 = vshrl.u32 %v112_v0, 7  ;;  %v1639_v25 = vld [vmem:[%s1982_s3 + $0x20] sm:$0xff]  ;;  %v1644_v26 = vld [vmem:[%s1982_s3 + $0x18] sm:$0xff]  ;;  %v1655_v35 = vld [vmem:[%s1982_s3 + $0x28] sm:$0xff]  ;;  %v1681_v53 = vand.u32 127, %v112_v0  ;;  %vm363_vm3 = vcmask 1043459  }
  0x5f   :  { %v200_v4 = vunpack.c.0.s8 %v199_v2  ;;  %v1665_v42 = vld [vmem:[%s1982_s3 + $0x30] sm:$0xff]  ;;  %v1673_v46 = vld [vmem:[%s1982_s3 + $0x38] sm:$0xff]  ;;  %vm365_vm4 = vcmask 1044484   ;;  %vm367_vm5 = vcmask 1045509   ;;  %vm369_vm6 = vcmask 1046534   ;;  %s1470_s20 = smov 64  }
  0x60   :  { %v1613_v8 = vsub.s32 0, %v1606_v3  ;;  %v1685_v55 = vsub.s32 %v1681_v53, %v1606_v3  ;;  %vm371_vm7 = vcmask 1047559   ;;  %vm374_vm8 = vcmask 64512  }
  0x61   :  { %v203_v5 = vsub.s32 %v200_v4, %v1606_v3  ;;  %vm1467_vm9 = vmmov 0   ;;  %vm122_vm10 = vcmask 130048   ;;  %vm706_vm12 = vcmask 523264  }
  0x63   :  { %v204_v7 = vrot.slane %v1609_v6, %v203_v5  ;;  %v211_v12 = vrot.slane %v197_v9, %v203_v5 }
  0x65   :  { %v220_v10 = vrot.slane %v204_v7, %v203_v5  ;;  %v212_v11 = vcombine.high %v204_v7, %v204_v7  ;;  %v227_v17 = vrot.slane %v211_v12, %v203_v5  ;;  %v213_v20 = vcombine.high %v211_v12, %v211_v12 }
  0x67   :  { %v249_v14 = vrot.slane %v220_v10, %v1613_v8  ;;  %v242_v15 = vcombine.high %v220_v10, %v220_v10  ;;  %v234_v16 = vrot.slane %v212_v11, %v203_v5  ;;  %v265_v27 = vrot.slane %v227_v17, %v1613_v8 }
  0x68   :  { %v241_v28 = vrot.slane %v213_v20, %v203_v5  ;;  %v243_v29 = vcombine.high %v227_v17, %v227_v17 }
  0x69   :  { %v286_v21 = vmul.f32 %v249_v14, %v1620_v13  ;;  %v257_v22 = vrot.slane %v242_v15, %v1613_v8  ;;  %v253_v23 = vrot.slane %v234_v16, %v1613_v8  ;;  %v244_v24 = vcombine.high %v234_v16, %v234_v16 }
  0x6a   :  { %v290_v34 = vmul.f32 %v265_v27, %v1639_v25  ;;  %v269_v36 = vrot.slane %v241_v28, %v1613_v8  ;;  %v245_v37 = vcombine.high %v241_v28, %v241_v28  ;;  %v273_v41 = vrot.slane %v243_v29, %v1613_v8 }
  0x6b   :  { %v295_v30 = vsel %vm294_vm0, %v286_v21, 0.0  ;;  %v288_v31 = vmul.f32 %v257_v22, %v1626_v18  ;;  %v287_v32 = vmul.f32 %v253_v23, %v1631_v19  ;;  %v261_v33 = vrot.slane %v244_v24, %v1613_v8 }
  0x6c   :  { %296 = vadd.xlane.f32.xlu0 %v295_v30  ;;  %v291_v44 = vmul.f32 %v269_v36, %v1655_v35  ;;  %v277_v45 = vrot.slane %v245_v37, %v1613_v8  ;;  %v307_v47 = vsel %vm294_vm0, %v290_v34, 0.0  ;;  %v292_v48 = vmul.f32 %v273_v41, %v1665_v42 }
  0x6d   :  { %v301_v38 = vsel %vm294_vm0, %v288_v31, 0.0  ;;  %v298_v39 = vsel %vm294_vm0, %v287_v32, 0.0  ;;  %v289_v40 = vmul.f32 %v261_v33, %v1644_v26  ;;  %v1465_v21 = vmov 0  }
  0x6e   :  { %302 = vadd.xlane.f32.xlu1 %v301_v38  ;;  %v310_v49 = vsel %vm294_vm0, %v291_v44, 0.0  ;;  %v293_v50 = vmul.f32 %v277_v45, %v1673_v46  ;;  %v313_v51 = vsel %vm294_vm0, %v292_v48, 0.0  ;;  %1241 = vset.pattern.permute.xlu0 %v1465_v21  ;;  %v385_v22 = vsub.s32 1, %v1606_v3 }
  0x6f   :  { %v304_v43 = vsel %vm294_vm0, %v289_v40, 0.0  ;;  %1240 = vset.pattern.permute.xlu1 %v1465_v21  ;;  %v389_v23 = vsub.s32 2, %v1606_v3  ;;  %v393_v24 = vsub.s32 3, %v1606_v3  ;;  %v397_v31 = vsub.s32 4, %v1606_v3 }
  0x70   :  { %299 = vadd.xlane.f32.xlu0 %v298_v39  ;;  %v316_v52 = vsel %vm294_vm0, %v293_v50, 0.0  ;;  %v401_v39 = vsub.s32 5, %v1606_v3  ;;  %v405_v44 = vsub.s32 6, %v1606_v3 }
  0x72   :  { %305 = vadd.xlane.f32.xlu1 %v304_v43 }
  0x74   :  { %308 = vadd.xlane.f32.xlu0 %v307_v47 }
  0x76   :  { %311 = vadd.xlane.f32.xlu1 %v310_v49  ;;  %v409_v49 = vsub.s32 7, %v1606_v3 }
  0x78   :  { %314 = vadd.xlane.f32.xlu0 %v313_v51 }
  0x7a   :  { %317 = vadd.xlane.f32.xlu1 %v316_v52 }
  0xf9   :  { %v297_v54 = vpop.xlane.xlu0 %296 }
  0xfa   :  { %v330_v58 = vrot.slane %v297_v54, %v1685_v55 }
  0xfb   :  { %v303_v56 = vpop.xlane.xlu1 %302 }
  0xfc   :  { %v338_v60 = vrot.slane %v303_v56, %v1685_v55 }
  0xfd   :  { %v300_v57 = vpop.xlane.xlu0 %299 }
  0xfe   :  { %v334_v59 = vrot.slane %v300_v57, %v1685_v55 }
  0xff   :  { %v306_v61 = vpop.xlane.xlu1 %305 }
 0x100   :  { %v360_v62 = vsel %vm359_vm1, %v334_v59, %v330_v58  ;;  %v342_v63 = vrot.slane %v306_v61, %v1685_v55 }
 0x101   :  { %v362_v0 = vsel %vm361_vm2, %v338_v60, %v360_v62  ;;  %v309_v1 = vpop.xlane.xlu0 %308 }
 0x102   :  { %v364_v2 = vsel %vm363_vm3, %v342_v63, %v362_v0  ;;  %v346_v4 = vrot.slane %v309_v1, %v1685_v55 }
 0x103   :  { %v312_v5 = vpop.xlane.xlu1 %311 }
 0x104   :  { %v366_v7 = vsel %vm365_vm4, %v346_v4, %v364_v2  ;;  %v350_v9 = vrot.slane %v312_v5, %v1685_v55 }
 0x105   :  { %v315_v10 = vpop.xlane.xlu0 %314 }
 0x106   :  { %v354_v11 = vrot.slane %v315_v10, %v1685_v55  ;;  %v368_v12 = vsel %vm367_vm5, %v350_v9, %v366_v7  ;;  %v120_v7 = vld [vmem:[%s1983_s4] sm:$0xff]  ;;  %v121_v9 = vld [vmem:[%s1983_s4 + $0x8] sm:$0xff] }
 0x107   :  { %v318_v14 = vpop.xlane.xlu1 %317 }
 0x108   :  { %v358_v15 = vrot.slane %v318_v14, %v1685_v55  ;;  %v370_v16 = vsel %vm369_vm6, %v354_v11, %v368_v12  ;;  %v1466_v11 = vmov 0.0|0.0   ;;  %v1191_v12 = vpack.c.bf16 %v121_v9, %v120_v7 }
 0x109   :  { %1190 = vmatprep.subr.bf16.mxu0 %v1466_v11  ;;  %1193 = vmatprep.subr.bf16.mxu1 %v1466_v11 }
 0x10a   :  { %v372_v17 = vsel %vm371_vm7, %v358_v15, %v370_v16  ;;  %1192 = vmatpush3.bf16.msra.mxu0 %v1191_v12 }
 0x10b   :  { %v375_v20 = vsel %vm374_vm8, %v372_v17, -inf  ;;  %1205 = vmatprep.subr.bf16.mxu0 %v1466_v11 }
 0x10c   :  { %376 = vmax.xlane.f32.xlu0 %v375_v20 }
 0x199   :  { %v377_v27 = vpop.xlane.xlu0 %376 }
 0x19a   :  { %v382_v28 = vrot.slane %v377_v27, %v1613_v8  ;;  %v386_v29 = vrot.slane %v377_v27, %v385_v22  ;;  %v390_v30 = vrot.slane %v377_v27, %v389_v23  ;;  %v394_v32 = vrot.slane %v377_v27, %v393_v24 }
 0x19b   :  { %v398_v40 = vrot.slane %v377_v27, %v397_v31  ;;  %v402_v45 = vrot.slane %v377_v27, %v401_v39  ;;  %v406_v50 = vrot.slane %v377_v27, %v405_v44 }
 0x19c   :  { %v419_v33 = vsub.f32 %v297_v54, %v382_v28  ;;  %v420_v34 = vsub.f32 %v300_v57, %v386_v29  ;;  %v421_v36 = vsub.f32 %v303_v56, %v390_v30  ;;  %v422_v41 = vsub.f32 %v306_v61, %v394_v32 }
 0x19d   :  { %v423_v47 = vsub.f32 %v309_v1, %v398_v40  ;;  %v424_v51 = vsub.f32 %v312_v5, %v402_v45  ;;  %v410_v57 = vrot.slane %v377_v27, %v409_v49  ;;  %v425_v58 = vsub.f32 %v315_v10, %v406_v50  ;;  %v111_v10 = vld [vmem:[%s1979_s0] sm:$0xff] }
 0x19e   :  { %v427_v37 = vmul.f32 1.442695, %v419_v33  ;;  %v429_v38 = vmul.f32 1.442695, %v420_v34  ;;  %v431_v43 = vmul.f32 1.442695, %v421_v36 }
 0x19f   :  { %v433_v48 = vmul.f32 1.442695, %v422_v41  ;;  %v435_v52 = vmul.f32 1.442695, %v423_v47  ;;  %v437_v59 = vmul.f32 1.442695, %v424_v51  ;;  %v426_v61 = vsub.f32 %v318_v14, %v410_v57 }
 0x1a0   :  { %1243 = vpow2.f32 %v427_v37  ;;  %v439_v62 = vmul.f32 1.442695, %v425_v58  ;;  %v1468_v14 = vmov 0.0  }
 0x1a1   :  { %1245 = vpow2.f32 %v429_v38  ;;  %v441_v0 = vmul.f32 1.442695, %v426_v61  ;;  %1138 = vmatprep.mubr.msk.f32.mxu0 %vm1467_vm9, %v1468_v14  ;;  %1157 = vmatprep.mubr.msk.f32.mxu1 %vm1467_vm9, %v1468_v14 }
 0x1a2   :  { %1247 = vpow2.f32 %v431_v43 }
 0x1a3   :  { %1249 = vpow2.f32 %v433_v48 }
 0x1a4   :  { %1251 = vpow2.f32 %v435_v52 }
 0x1a5   :  { %1253 = vpow2.f32 %v437_v59 }
 0x1a6   :  { %1255 = vpow2.f32 %v439_v62 }
 0x1a7   :  { %1257 = vpow2.f32 %v441_v0 }
 0x1aa   :  { %v1723_v54 = vpop.eup %1243 }
 0x1ab   :  { %v1725_v56 = vpop.eup %1245  ;;  %452 = vperm.xlu1 %1240, %v1723_v54  }
 0x1ac   :  { %455 = vperm.xlu0 %1241, %v1725_v56   ;;  %v1731_v60 = vpop.eup %1247 }
 0x1ad   :  { %v1734_v63 = vpop.eup %1249 }
 0x1ae   :  { %v1737_v1 = vpop.eup %1251 }
 0x1af   :  { %458 = vperm.xlu1 %1240, %v1731_v60   ;;  %v1740_v2 = vpop.eup %1253 }
 0x1b0   :  { %v1743_v4 = vpop.eup %1255 }
 0x1b1   :  { %v1746_v5 = vpop.eup %1257 }
 0x1b3   :  { %461 = vperm.xlu1 %1240, %v1734_v63  }
 0x1b7   :  { %464 = vperm.xlu1 %1240, %v1737_v1  }
 0x1bb   :  { %467 = vperm.xlu1 %1240, %v1740_v2  }
 0x1bf   :  { %470 = vperm.xlu1 %1240, %v1743_v4  }
 0x1c3   :  { %473 = vperm.xlu1 %1240, %v1746_v5  }
 0x1c7   :  { %115 = vperm.xlu1 %1240, %v111_v10  }
 0x22a   :  { %v453_v15 = vpop.permute.xlu1 %452 }
 0x22b   :  { %v456_v21 = vpop.permute.xlu0 %455  ;;  %v478_v29 = vrot.slane %v453_v15, %v1685_v55 }
 0x22c   :  { %v482_v28 = vrot.slane %v456_v21, %v1685_v55 }
 0x22e   :  { %v459_v16 = vpop.permute.xlu1 %458  ;;  %v507_v36 = vsel %vm359_vm1, %v482_v28, %v478_v29 }
 0x22f   :  { %v486_v30 = vrot.slane %v459_v16, %v1685_v55  ;;  %v698_v16 = vld [vmem:[%s1984_s5 + $0x38] sm:$0xff] }
 0x231   :  { %v508_v38 = vsel %vm361_vm2, %v486_v30, %v507_v36 }
 0x232   :  { %v462_v17 = vpop.permute.xlu1 %461 }
 0x233   :  { %v490_v32 = vrot.slane %v462_v17, %v1685_v55 }
 0x235   :  { %v509_v41 = vsel %vm363_vm3, %v490_v32, %v508_v38 }
 0x236   :  { %v465_v20 = vpop.permute.xlu1 %464 }
 0x237   :  { %v494_v33 = vrot.slane %v465_v20, %v1685_v55 }
 0x239   :  { %v510_v43 = vsel %vm365_vm4, %v494_v33, %v509_v41 }
 0x23a   :  { %v468_v27 = vpop.permute.xlu1 %467 }
 0x23b   :  { %v498_v37 = vrot.slane %v468_v27, %v1685_v55 }
 0x23d   :  { %v511_v47 = vsel %vm367_vm5, %v498_v37, %v510_v43 }
 0x23e   :  { %v471_v34 = vpop.permute.xlu1 %470 }
 0x23f   :  { %v502_v40 = vrot.slane %v471_v34, %v1685_v55 }
 0x241   :  { %v512_v50 = vsel %vm369_vm6, %v502_v40, %v511_v47 }
 0x242   :  { %v474_v45 = vpop.permute.xlu1 %473 }
 0x243   :  { %v506_v48 = vrot.slane %v474_v45, %v1685_v55 }
 0x245   :  { %v513_v51 = vsel %vm371_vm7, %v506_v48, %v512_v50 }
 0x246   :  { %v116_v52 = vpop.permute.xlu1 %115  ;;  %v515_v57 = vsel %vm374_vm8, %v513_v51, 0.0 }
 0x247   :  { %vm117_vm11 = vcmp.eq.s32.totalorder %v1681_v53, %v116_v52  ;;  %516 = vadd.xlane.f32.xlu1 %v515_v57 }
 0x248   :  { %v1099_v58 = vsel %vm117_vm11, 1.0, %v1468_v14 }
 0x249   :  { %1139 = vmatmul.mubr.msk.f32.vlgmr.msra.gmra.mrb[0].mxu0 %vm122_vm10, %v1099_v58 }
 0x24a   :  { %1176 = vmatprep.mubr.msk.f32.mxu0 %vm1467_vm9, %v1468_v14 }
 0x258   :  { %781 = vrot.lane.b32.xlu1 %v1609_v6, %s1469_s16  ;;  %v697_v6 = vld [vmem:[%s1984_s5 + $0x30] sm:$0xff] }
 0x259   :  { %v1203_v17 = vpack.c.bf16 %v698_v16, %v697_v6 }
 0x2d4   :  { %v517_v59 = vpop.xlane.xlu1 %516 }
 0x2d5   :  { %1259 = vrcp.f32 %v517_v59 }
 0x2df   :  { %v1260_v61 = vpop.eup %1259 }
 0x2e0   :  { %v523_v62 = vrot.slane %v1260_v61, %v1613_v8  ;;  %v527_v7 = vrot.slane %v1260_v61, %v385_v22  ;;  %v531_v9 = vrot.slane %v1260_v61, %v389_v23  ;;  %v535_v12 = vrot.slane %v1260_v61, %v393_v24 }
 0x2e2   :  { %v560_v0 = vmul.f32 %v1723_v54, %v523_v62  ;;  %v561_v53 = vmul.f32 %v1725_v56, %v527_v7  ;;  %v562_v10 = vmul.f32 %v1731_v60, %v531_v9  ;;  %v563_v8 = vmul.f32 %v1734_v63, %v535_v12 }
 0x2e3   :  { %v539_v54 = vrot.slane %v1260_v61, %v397_v31  ;;  %v543_v56 = vrot.slane %v1260_v61, %v401_v39  ;;  %v547_v60 = vrot.slane %v1260_v61, %v405_v44  ;;  %v551_v63 = vrot.slane %v1260_v61, %v409_v49  ;;  %v691_v39 = vld [vmem:[%s1984_s5] sm:$0xff]  ;;  %v693_v44 = vld [vmem:[%s1984_s5 + $0x10] sm:$0xff]  ;;  %v694_v49 = vld [vmem:[%s1984_s5 + $0x18] sm:$0xff] }
 0x2e4   :  { %570 = vperm.xlu0 %1241, %v560_v0  }
 0x2e5   :  { %v564_v22 = vmul.f32 %v1737_v1, %v539_v54  ;;  %v565_v23 = vmul.f32 %v1740_v2, %v543_v56  ;;  %v566_v24 = vmul.f32 %v1743_v4, %v547_v60  ;;  %v567_v31 = vmul.f32 %v1746_v5, %v551_v63  ;;  %v692_v1 = vld [vmem:[%s1984_s5 + $0x8] sm:$0xff]  ;;  %v695_v4 = vld [vmem:[%s1984_s5 + $0x20] sm:$0xff] }
 0x2e6   :  { %v1194_v3 = vpack.c.bf16 %v692_v1, %v691_v39  ;;  %v1197_v2 = vpack.c.bf16 %v694_v49, %v693_v44  ;;  %v696_v5 = vld [vmem:[%s1984_s5 + $0x28] sm:$0xff]  ;;  %s1473_s5 = smov [#allocation11]  }
 0x2e7   :  { %v1200_v15 = vpack.c.bf16 %v696_v5, %v695_v4  ;;  %s1061_s8 = sshll.u32 %s1473_s5, 4  ;;  %s1062_s8 = int_to_ptr.vmem [resolvable:$true] %s1061_s8 }
 0x2e8   :  { %575 = vperm.xlu0 %1241, %v561_v53   ;;  %1195 = vmatpush3.bf16.msra.mxu1 %v1194_v3 }
 0x2e9   :  { %1196 = vmatprep.subr.bf16.mxu1 %v1466_v11 }
 0x2ec   :  { %580 = vperm.xlu0 %1241, %v562_v10   ;;  %1198 = vmatpush3.bf16.msra.mxu1 %v1197_v2 }
 0x2ed   :  { %1199 = vmatprep.subr.bf16.mxu1 %v1466_v11 }
 0x2f0   :  { %585 = vperm.xlu0 %1241, %v563_v8   ;;  %1201 = vmatpush3.bf16.msra.mxu1 %v1200_v15 }
 0x2f1   :  { %1202 = vmatprep.subr.bf16.mxu1 %v1466_v11 }
 0x2f4   :  { %590 = vperm.xlu0 %1241, %v564_v22   ;;  %1204 = vmatpush3.bf16.msra.mxu1 %v1203_v17 }
 0x2f5   :  { %1217 = vmatprep.subr.bf16.mxu1 %v1466_v11 }
 0x2f8   :  { %595 = vperm.xlu0 %1241, %v565_v23  }
 0x2fc   :  { %600 = vperm.xlu0 %1241, %v566_v24  }
 0x300   :  { %605 = vperm.xlu0 %1241, %v567_v31  }
 0x31c   :  { %v1837_v20 = vpop.f32.mrb[0].mxu0 }
 0x31d   :  { %v1140_v21 = vpop.f32.mrb[1].mxu0 }
 0x363   :  { %v571_v27 = vpop.permute.xlu0 %570 }
 0x364   :  { %v1010_v29 = vrot.slane %v571_v27, %v1685_v55  ;;  %v608_v34 = vmul.f32 %v571_v27, %v1620_v13 }
 0x366   :  { %v616_v43 = vsel %vm294_vm0, %v608_v34, 0.0 }
 0x367   :  { %v576_v28 = vpop.permute.xlu0 %575  ;;  %v617_v13 = vrot.slane %v616_v43, 4 }
 0x368   :  { %v1014_v30 = vrot.slane %v576_v28, %v1685_v55  ;;  %v609_v32 = vmul.f32 %v576_v28, %v1631_v19 }
 0x369   :  { %v618_v0 = vadd.f32 %v617_v13, %v616_v43  ;;  %v785_v43 = vld [vmem:[%s1986_s7] sm:$0xff]  ;;  %v788_v13 = vld [vmem:[%s1986_s7 + $0x18] sm:$0xff] }
 0x36a   :  { %v1039_v33 = vsel %vm359_vm1, %v1014_v30, %v1010_v29  ;;  %v623_v40 = vsel %vm294_vm0, %v609_v32, 0.0 }
 0x36b   :  { %v581_v36 = vpop.permute.xlu0 %580  ;;  %v624_v48 = vrot.slane %v623_v40, 4  ;;  %v619_v23 = vrot.slane %v618_v0, 2 }
 0x36c   :  { %v610_v37 = vmul.f32 %v581_v36, %v1626_v18  ;;  %v1018_v38 = vrot.slane %v581_v36, %v1685_v55 }
 0x36d   :  { %v625_v59 = vadd.f32 %v624_v48, %v623_v40 }
 0x36e   :  { %v1040_v41 = vsel %vm361_vm2, %v1018_v38, %v1039_v33  ;;  %v630_v45 = vsel %vm294_vm0, %v610_v37, 0.0 }
 0x36f   :  { %v586_v47 = vpop.permute.xlu0 %585  ;;  %v631_v51 = vrot.slane %v630_v45, 4  ;;  %v626_v8 = vrot.slane %v625_v59, 2 }
 0x370   :  { %v611_v19 = vmul.f32 %v586_v47, %v1644_v26  ;;  %v1022_v50 = vrot.slane %v586_v47, %v1685_v55 }
 0x371   :  { %v632_v7 = vadd.f32 %v631_v51, %v630_v45  ;;  %v627_v1 = vadd.f32 %v626_v8, %v625_v59  ;;  %v786_v45 = vld [vmem:[%s1986_s7 + $0x8] sm:$0xff] }
 0x372   :  { %v637_v18 = vsel %vm294_vm0, %v611_v19, 0.0  ;;  %v1041_v52 = vsel %vm363_vm3, %v1022_v50, %v1040_v41  ;;  %v1206_v50 = vpack.c.bf16 %v786_v45, %v785_v43  ;;  %v913_v43 = vld [vmem:[%s1988_s9 + $0x10] sm:$0xff] }
 0x373   :  { %v638_v57 = vrot.slane %v637_v18, 4  ;;  %v591_v58 = vpop.permute.xlu0 %590  ;;  %v633_v60 = vrot.slane %v632_v7, 2  ;;  %v628_v27 = vrot.slane %v627_v1, 1 }
 0x374   :  { %v612_v61 = vmul.f32 %v591_v58, %v1639_v25  ;;  %v1026_v62 = vrot.slane %v591_v58, %v1685_v55  ;;  %1207 = vmatpush3.bf16.msra.mxu0 %v1206_v50 }
 0x375   :  { %v639_v9 = vadd.f32 %v638_v57, %v637_v18  ;;  %v634_v4 = vadd.f32 %v633_v60, %v632_v7  ;;  %v629_v40 = vadd.f32 %v628_v27, %v627_v1  ;;  %1208 = vmatprep.subr.bf16.mxu0 %v1466_v11  ;;  %v102_v27 = vld [vmem:[#allocation5] sm:$0xff] }
 0x376   :  { %v644_v53 = vsel %vm294_vm0, %v612_v61, 0.0  ;;  %v1042_v26 = vsel %vm365_vm4, %v1026_v62, %v1041_v52  ;;  %v789_v62 = vld [vmem:[%s1986_s7 + $0x20] sm:$0xff] }
 0x377   :  { %v645_v10 = vrot.slane %v644_v53, 4  ;;  %v596_v12 = vpop.permute.xlu0 %595  ;;  %v640_v63 = vrot.slane %v639_v9, 2  ;;  %v635_v33 = vrot.slane %v634_v4, 1 }
 0x378   :  { %v613_v54 = vmul.f32 %v596_v12, %v1655_v35  ;;  %v1030_v22 = vrot.slane %v596_v12, %v1685_v55  ;;  %v620_v35 = vadd.f32 %v619_v23, %v618_v0  ;;  %v790_v0 = vld [vmem:[%s1986_s7 + $0x28] sm:$0xff] }
 0x379   :  { %v646_v56 = vadd.f32 %v645_v10, %v644_v53  ;;  %v641_v6 = vadd.f32 %v640_v63, %v639_v9  ;;  %v636_v18 = vadd.f32 %v635_v33, %v634_v4 }
 0x37a   :  { %v651_v25 = vsel %vm294_vm0, %v613_v54, 0.0  ;;  %v1043_v24 = vsel %vm367_vm5, %v1030_v22, %v1042_v26  ;;  %v621_v32 = vrot.slane %v620_v35, 1  ;;  %v1212_v54 = vpack.c.bf16 %v790_v0, %v789_v62 }
 0x37b   :  { %v652_v31 = vrot.slane %v651_v25, 4  ;;  %v601_v39 = vpop.permute.xlu0 %600  ;;  %v647_v44 = vrot.slane %v646_v56, 2  ;;  %v642_v36 = vrot.slane %v641_v6, 1 }
 0x37c   :  { %v614_v3 = vmul.f32 %v601_v39, %v1665_v42  ;;  %v1034_v49 = vrot.slane %v601_v39, %v1685_v55  ;;  %v622_v51 = vadd.f32 %v621_v32, %v620_v35  ;;  %v792_v39 = vld [vmem:[%s1986_s7 + $0x38] sm:$0xff] }
 0x37d   :  { %v653_v2 = vadd.f32 %v652_v31, %v651_v25  ;;  %v648_v28 = vadd.f32 %v647_v44, %v646_v56  ;;  %v643_v52 = vadd.f32 %v642_v36, %v641_v6  ;;  %v791_v31 = vld [vmem:[%s1986_s7 + $0x30] sm:$0xff] }
 0x37e   :  { %v658_v5 = vsel %vm294_vm0, %v614_v3, 0.0  ;;  %v1868_v15 = vsel %vm369_vm6, %v1034_v49, %v1043_v24  ;;  %v680_v7 = vsel %vm359_vm1, %v629_v40, %v622_v51  ;;  %v1215_v1 = vpack.c.bf16 %v792_v39, %v791_v31  ;;  %v1101_v44 = vld [vmem:[#allocation7] ss:$0 sm:$0xff]  ;;  %v911_v40 = vld [vmem:[%s1988_s9] sm:$0xff]  ;;  %v1106_v51 = vld [vmem:[#allocation10] ss:$0 sm:$0xff] }
 0x37f   :  { %v654_v16 = vrot.slane %v653_v2, 2  ;;  %v659_v17 = vrot.slane %v658_v5, 4  ;;  %v1870_v21 = vpop.permute.xlu0 %605  ;;  %v649_v41 = vrot.slane %v648_v28, 1  ;;  %v681_v10 = vsel %vm361_vm2, %v636_v18, %v680_v7 }
 0x380   :  { %v615_v42 = vmul.f32 %v1870_v21, %v1673_v46  ;;  %v787_v46 = vld [vmem:[%s1986_s7 + $0x10] sm:$0xff]  ;;  %v682_v8 = vsel %vm363_vm3, %v643_v52, %v681_v10 }
 0x381   :  { %v655_v29 = vadd.f32 %v654_v16, %v653_v2  ;;  %v660_v30 = vadd.f32 %v659_v17, %v658_v5  ;;  %v1209_v59 = vpack.c.bf16 %v788_v13, %v787_v46  ;;  %v650_v61 = vadd.f32 %v649_v41, %v648_v28  ;;  %v912_v41 = vld [vmem:[%s1988_s9 + $0x8] sm:$0xff]  ;;  %v914_v46 = vld [vmem:[%s1988_s9 + $0x18] sm:$0xff]  ;;  %s1471_s9 = smov 96  }
 0x382   :  { %v665_v34 = vsel %vm294_vm0, %v615_v42, 0.0  ;;  %v1218_v45 = vpack.c.bf16 %v912_v41, %v911_v40 }
 0x383   :  { %v661_v37 = vrot.slane %v660_v30, 2  ;;  %v666_v38 = vrot.slane %v665_v34, 4  ;;  %v656_v47 = vrot.slane %v655_v29, 1  ;;  %1210 = vmatpush3.bf16.msra.mxu0 %v1209_v59  ;;  %v683_v22 = vsel %vm365_vm4, %v650_v61, %v682_v8 }
 0x384   :  { %1211 = vmatprep.subr.bf16.mxu0 %v1466_v11 }
 0x385   :  { %v662_v48 = vadd.f32 %v661_v37, %v660_v30  ;;  %v667_v19 = vadd.f32 %v666_v38, %v665_v34  ;;  %v657_v53 = vadd.f32 %v656_v47, %v655_v29  ;;  %v1221_v47 = vpack.c.bf16 %v914_v46, %v913_v43 }
 0x387   :  { %v663_v57 = vrot.slane %v662_v48, 1  ;;  %v668_v58 = vrot.slane %v667_v19, 2  ;;  %v684_v23 = vsel %vm367_vm5, %v657_v53, %v683_v22  ;;  %1213 = vmatpush3.bf16.msra.mxu0 %v1212_v54 }
 0x388   :  { %1214 = vmatprep.subr.bf16.mxu0 %v1466_v11 }
 0x389   :  { %v669_v26 = vadd.f32 %v668_v58, %v667_v19  ;;  %v664_v9 = vadd.f32 %v663_v57, %v662_v48 }
 0x38b   :  { %v670_v12 = vrot.slane %v669_v26, 1  ;;  %v685_v60 = vsel %vm369_vm6, %v664_v9, %v684_v23  ;;  %1216 = vmatpush3.bf16.msra.mxu0 %v1215_v1 }
 0x38d   :  { %v671_v56 = vadd.f32 %v670_v12, %v669_v26 }
 0x38f   :  { %v686_v25 = vsel %vm371_vm7, %v671_v56, %v685_v60 }
 0x390   :  { %687 = vrot.lane.b32.xlu0 %v686_v25, %s1469_s16 }
 0x402   :  { %v688_v24 = vpop.permute.xlu0 %687 }
 0x403   :  { %v690_v63 = vsel %vm294_vm0, %v1837_v20, %v688_v24  ;;  %v782_v20 = vpop.permute.xlu1 %781 }
 0x404   :  { %1158 = vmatmul.mubr.msk.f32.vlgmr.msra.gmra.mrb[0].mxu1 %vm706_vm12, %v690_v63 }
 0x405   :  { %1187 = vmatprep.mubr.msk.f32.mxu1 %vm1467_vm9, %v1468_v14  ;;  %v1103_v14 = vld [vmem:[#allocation8] ss:$0 sm:$0xff]  ;;  %1219 = vmatpush3.bf16.msra.mxu1 %v1218_v45 }
 0x406   :  { %1220 = vmatprep.subr.bf16.mxu1 %v1466_v11 }
 0x409   :  { %1222 = vmatpush3.bf16.msra.mxu1 %v1221_v47 }
 0x4d7   :  { %v776_v3 = vpop.f32.mrb[0].mxu1 }
 0x4d8   :  { %v777_v49 = vadd.f32 %v1101_v44, %v776_v3  ;;  %v1159_v2 = vpop.f32.mrb[1].mxu1 }
 0x4da   :  { %v780_v35 = vmax.f32 %v777_v49, 0.0 }
 0x4dc   :  { %v784_v4 = vsel %vm294_vm0, %v780_v35, %v782_v20 }
 0x4dd   :  { %1177 = vmatmul.mubr.msk.f32.vlgmr.msra.gmra.mrb[2].mxu0 %vm706_vm12, %v784_v4 }
 0x5b0   :  { %v869_v5 = vpop.f32.mrb[2].mxu0 }
 0x5b1   :  { %v870_v6 = vadd.f32 %v1103_v14, %v869_v5  ;;  %v1178_v16 = vpop.f32.mrb[3].mxu0 }
 0x5b3   :  { %1261 = vtanh.f32 %v870_v6  ;;  %v1105_v28 = vmul.f32 -1.442695, %v870_v6 }
 0x5b5   :  { %1263 = vpow2.f32 %v1105_v28 }
 0x5bd   :  { %v1262_v17 = vpop.eup %1261 }
 0x5be   :  { %886 = vrot.lane.b32.xlu0 %v1262_v17, %s1470_s20 }
 0x5bf   :  { %v1264_v42 = vpop.eup %1263 }
 0x5c0   :  { %v876_v29 = vadd.f32 1.0, %v1264_v42 }
 0x5c2   :  { %881 = vrot.lane.b32.xlu0 %v102_v27, %s1469_s16  ;;  %1265 = vrcp.f32 %v876_v29 }
 0x5cc   :  { %v1266_v30 = vpop.eup %1265 }
 0x630   :  { %v887_v32 = vpop.permute.xlu0 %886 }
 0x631   :  { %v889_v33 = vmul.f32 %v1266_v30, %v887_v32 }
 0x633   :  { %891 = vrot.lane.b32.xlu0 %v889_v33, %s1469_s16 }
 0x634   :  { %v882_v34 = vpop.permute.xlu0 %881 }
 0x635   :  { %v884_v36 = vmul.f32 %v1266_v30, %v882_v34 }
 0x6a5   :  { %v892_v37 = vpop.permute.xlu0 %891 }
 0x6a6   :  { %v894_v38 = vadd.f32 %v892_v37, %v884_v36 }
 0x6a8   :  { %1267 = vtanh.f32 %v894_v38 }
 0x6b2   :  { %v1268_v48 = vpop.eup %1267 }
 0x6b3   :  { %897 = vrot.lane.b32.xlu0 %v1268_v48, %s1470_s20 }
 0x725   :  { %v898_v19 = vpop.permute.xlu0 %897 }
 0x726   :  { %v900_v50 = vmul.f32 %v1266_v30, %v898_v19 }
 0x728   :  { %902 = vrot.lane.b32.xlu1 %v900_v50, %s1469_s16  ;;  %s1472_s16 = smov [#allocation12]  }
 0x729   :  { %s1071_s27 = sshll.u32 %s1472_s16, 4  ;;  %s1072_s27 = int_to_ptr.vmem [resolvable:$true] %s1071_s27 }
 0x72a   :  { %s1383_s28 = scalar_lea.vmem %s1072_s27, 128  ;;  %p1388_p13 = scmp.lt.s32.totalorder %s1072_s27, %s1072_s27 }
 0x72b   :  { %p1384_p12 = scmp.ne.s32.totalorder %s1072_s27, %s1383_s28  ;;  %p1389_p0 = scmp.lt.s32.totalorder %s1383_s28, %s1383_s28 }
 0x72d   :  { %p1390_p1 = por %p1389_p0, %p1388_p13 }
 0x72f   :  { %p1391_p2 = pnand %p1390_p1, %p1384_p12 }
 0x79a   :  { %v903_v13 = vpop.permute.xlu1 %902 }
 0x79b   :  { %905 = vst.msk [vmem:[#allocation11] sm:$0xff] %vm294_vm0, %v903_v13  ;;  %1188 = vmatmul.mubr.msk.f32.vlgmr.msra.gmra.mrb[2].mxu1 %vm294_vm0, %v903_v13 }
 0x86e   :  { %v990_v18 = vpop.f32.mrb[2].mxu1 }
 0x86f   :  { %v991_v52 = vadd.f32 %v1106_v51, %v990_v18  ;;  %v1189_v57 = vpop.f32.mrb[3].mxu1 }
 0x871   :  { %v994_v58 = vsel %vm122_vm10, %v991_v52, -inf }
 0x872   :  { %995 = vmax.xlane.f32.xlu0 %v994_v58 }
 0x8ff   :  { %v996_v11 = vpop.xlane.xlu0 %995 }
 0x900   :  { %v997_v59 = vsub.f32 %v991_v52, %v996_v11 }
 0x902   :  { %v998_v61 = vmul.f32 1.442695, %v997_v59 }
 0x904   :  { %1269 = vpow2.f32 %v998_v61 }
 0x90e   :  { %v1270_v62 = vpop.eup %1269 }
 0x90f   :  { %v1000_v0 = vsel %vm122_vm10, %v1270_v62, 0.0 }
 0x910   :  { %1001 = vadd.xlane.f32.xlu1 %v1000_v0 }
 0x921   :  { %907 = vrot.lane.b32.xlu1 %v894_v38, %s1471_s9 }
 0x99d   :  { %v1002_v7 = vpop.xlane.xlu1 %1001 }
 0x99e   :  { %1271 = vlog2.f32 %v1002_v7 }
 0x9a1   :  { %v908_v53 = vpop.permute.xlu1 %907 }
 0x9a2   :  { %910 = vst.msk [vmem:[#allocation12] sm:$0xff] %vm294_vm0, %v908_v53 }
 0x9a3   :  { %1394 = shalt.err (!%p1391_p2)
}
 0x9a4   :  { %s1395_s30 = scalar_lea.hbm %s1991_s12, 128 }
 0x9a5   :  { %p1396_p3 = scmp.ne.s32.totalorder %s1991_s12, %s1395_s30  ;;  %p1399_p4 = scmp.lt.u32.totalorder %s1395_s30, %s1991_s12 }
 0x9a7   :  { %p1401_p5 = pnand %p1399_p4, %p1396_p3 }
 0x9a9   :  { %1404 = shalt.err (!%p1401_p5)
}
 0x9aa   :  { %1074 = dma.vmem_to_hbm [thread:$0]  %s1072_s27, 128, %s1991_s12, [#allocation13]   ;;  %v1272_v26 = vpop.eup %1271 }
 0x9ab   :  { %s1405_s10 = scalar_lea.vmem %s1062_s8, 128  ;;  %p1410_p7 = scmp.lt.s32.totalorder %s1062_s8, %s1062_s8 }
 0x9ac   :  { %p1406_p6 = scmp.ne.s32.totalorder %s1062_s8, %s1405_s10  ;;  %p1411_p8 = scmp.lt.s32.totalorder %s1405_s10, %s1405_s10 }
 0x9ae   :  { %p1412_p9 = por %p1411_p8, %p1410_p7 }
 0x9b0   :  { %p1413_p10 = pnand %p1412_p9, %p1406_p6 }
 0x9b2   :  { %1416 = shalt.err (!%p1413_p10)
}
 0x9b3   :  { %s1417_s18 = scalar_lea.hbm %s1990_s11, 128 }
 0x9b4   :  { %p1418_p11 = scmp.ne.s32.totalorder %s1990_s11, %s1417_s18  ;;  %p1421_p12 = scmp.lt.u32.totalorder %s1417_s18, %s1990_s11 }
 0x9b6   :  { %p1423_p13 = pnand %p1421_p12, %p1418_p11 }
 0x9b8   :  { %1426 = shalt.err (!%p1423_p13)
}
 0x9b9   :  { %1064 = dma.vmem_to_hbm [thread:$0]  %s1062_s8, 128, %s1990_s11, [#allocation4]   ;;  %v1004_v9 = vmul.f32 0.6931472, %v1272_v26  ;;  %v1038_v8 = vrot.slane %v1870_v21, %v1685_v55  ;;  %vm1052_vm13 = vcmask 195584  }
 0x9ba   :  { %s1474_s22 = smov 8   ;;  %s1475_s23 = smov [#allocation14]  }
 0x9bb   :  { %v1005_v10 = vadd.f32 %v1004_v9, %v996_v11  ;;  %s1081_s24 = sshll.u32 %s1475_s23, 4  ;;  %v1045_v54 = vsel %vm371_vm7, %v1038_v8, %v1868_v15  ;;  %s1082_s24 = int_to_ptr.vmem [resolvable:$true] %s1081_s24 }
 0x9bc   :  { %s1427_s11 = scalar_lea.vmem %s1082_s24, 128  ;;  %p1432_p1 = scmp.lt.s32.totalorder %s1082_s24, %s1082_s24 }
 0x9bd   :  { %v1006_v12 = vsub.f32 %v991_v52, %v1005_v10  ;;  %p1428_p0 = scmp.ne.s32.totalorder %s1082_s24, %s1427_s11  ;;  %p1433_p2 = scmp.lt.s32.totalorder %s1427_s11, %s1427_s11 }
 0x9bf   :  { %1048 = vrot.lane.b32.xlu0 %v1006_v12, %s1474_s22  ;;  %p1434_p3 = por %p1433_p2, %p1432_p1 }
 0x9c1   :  { %p1435_p4 = pnand %p1434_p3, %p1428_p0 }
 0xa31   :  { %v1049_v22 = vpop.permute.xlu0 %1048 }
 0xa32   :  { %v1051_v56 = vsel %vm374_vm8, %v1045_v54, %v1049_v22 }
 0xa33   :  { %v1053_v23 = vsel %vm1052_vm13, %v1051_v56, 0.0 }
 0xa34   :  { %1054 = vst [vmem:[#allocation14] sm:$0xff] %v1053_v23 }
 0xa35   :  { %1438 = shalt.err (!%p1435_p4)
}
 0xa36   :  { %s1439_s16 = scalar_lea.hbm %s1992_s13, 128 }
 0xa37   :  { %p1440_p5 = scmp.ne.s32.totalorder %s1992_s13, %s1439_s16  ;;  %p1443_p6 = scmp.lt.u32.totalorder %s1439_s16, %s1992_s13 }
 0xa39   :  { %p1445_p7 = pnand %p1443_p6, %p1440_p5 }
 0xa3b   :  { %1448 = shalt.err (!%p1445_p7)
}
 0xa3c   :  { %1084 = dma.vmem_to_hbm [thread:$0]  %s1082_s24, 128, %s1992_s13, [#allocation13]  }
 0xa3d   :  { %1455 = dma.done.wait [#allocation4], 128  }
 0xa3e   :  { %1456 = vsyncadd [#allocation4], 4294967168 }
 0xa3f   :  { %1457 = dma.done.wait [#allocation13], 256  }
 0xa40   :  { %1458 = vsyncadd [#allocation13], 4294967040 }
 0xa41   :  { %1094 = vsyncpa [#allocation3], 1 }
 0xa42   :  { %1095 = vsyncpa [#allocation6], 1 }
 0xa43   :  { %1096 = vsyncpa [#allocation9], 1 }
 0xa44   :  { %1097 = vsyncpa [#allocation4], 1 }
 0xa45   :  { %1098 = vsyncpa [#allocation13], 1 }

</bundles_post_ra>
